<compile_context>
chip_gen: v7x
topology: tpu7x:2x2x1
jax: 0.10.0
libtpu: 0.0.40
codegen_flags: <defaults>
</compile_context>

<pallas_src>
import functools

import jax
import jax.numpy as jnp
from jax.experimental import pallas as pl
from jax.experimental.pallas import tpu as pltpu


def _round_up(x, m):
    return ((x + m - 1) // m) * m


def _pick_tile(hw, max_tile):
    """Pick a lane tile (multiple of 128), preferring one that divides H*W exactly
    so the wrapper never has to pad / copy the logit slab in HBM."""
    max_tile = max(128, (max_tile // 128) * 128)
    if hw % 128 == 0:
        cand = min(max_tile, hw)
        while cand >= 128:
            if hw % cand == 0:
                return cand, hw          # no padding needed
            cand -= 128
    tile = min(max_tile, _round_up(hw, 128))
    return tile, _round_up(hw, tile)     # ragged case: pad to a tile multiple


def _sce_kernel(x_ref, t_ref, out_ref, *, ignore_index):
    """Per-(image, pixel-half, pixel-tile) partial sums, lane-dense layout.

    x_ref:   (C, T)  logits (model dtype), classes on sublanes, pixels on lanes
    t_ref:   (1, T)  integer labels (ignore_index marks invalid / padding pixels)
    out_ref: (3, T)  f32 per-lane accumulators: row0 = ce sum, row1 = valid count,
                     row2 = rce sum.  Final cross-lane reduce happens in the wrapper.
    """
    j = pl.program_id(2)

    @pl.when(j == 0)
    def _():
        out_ref[...] = jnp.zeros_like(out_ref)

    x = x_ref[...].astype(jnp.float32)           # (C, T) upcast in-vreg
    t = t_ref[...].astype(jnp.int32)             # (1, T) labels, native dtype in HBM

    validf = (t != ignore_index).astype(jnp.float32)          # (1, T)

    # numerically stable log-softmax over the class (sublane) axis
    m = jnp.max(x, axis=0, keepdims=True)        # (1, T)
    z = x - m                                    # (C, T)
    ez = jnp.exp(z)                              # (C, T)
    sez = jnp.sum(ez, axis=0, keepdims=True)     # (1, T)
    lse = jnp.log(sez)                           # (1, T)

    # gather logit / exp at the target class with a single select (no float one-hot)
    c_iota = jax.lax.broadcasted_iota(jnp.int32, x.shape, 0)   # (C, T)
    is_t = c_iota == t                                         # (C, T) bool
    z_t = jnp.sum(jnp.where(is_t, z, 0.0), axis=0, keepdims=True)   # (1, T)
    e_t = jnp.sum(jnp.where(is_t, ez, 0.0), axis=0, keepdims=True)  # (1, T)

    ce_row = (lse - z_t) * validf                # -log_softmax at target, masked
    sm_t = e_t / sez                             # softmax at target (exact)
    rce_row = -jnp.log(sm_t + 1e-6) * validf     # (1, T)

    # accumulate the three per-lane partial rows in one shot
    out_ref[...] += jnp.concatenate([ce_row, validf, rce_row], axis=0)


def sym_cross_entropy(inputs, targets, *, alpha=1.0, beta=0.1,
                      num_classes=14, ignore_index=255, tile_hw=16384):
    """inputs: (N, C, H, W) float logits (any float dtype, e.g. bf16 or f32);
       targets: (N, H, W) integer labels, ignore_index marks ignored pixels."""
    # TODO(synk): PyTorch's debug_log(9) host-side print is intentionally omitted.
    N, C, H, W = inputs.shape
    assert C == num_classes
    hw = H * W
    P = N * hw

    tile, hw_pad = _pick_tile(hw, tile_hw)
    tiles = hw_pad // tile
    # Split each image's pixel tiles into two "parallel" halves so v7x megacore has
    # work on both TensorCores even when N == 1 (no effect on single-TC v5e/v6e).
    halves = 2 if (tiles % 2 == 0 and tiles >= 2) else 1
    tiles_per_half = tiles // halves

    # Native lane-dense layout: collapsing (H, W) is free in row-major; no transpose,
    # no dtype cast in HBM (the BlockSpec DMAs the model's dtype; upcast is in-kernel).
    x = inputs.reshape(N, C, hw)
    t = targets.reshape(N, 1, hw)
    if t.dtype not in (jnp.int32, jnp.uint8, jnp.int8, jnp.uint16, jnp.int16):
        t = t.astype(jnp.int32)

    if hw_pad != hw:
        # Only taken when no 128-multiple tile divides H*W exactly.
        x = jnp.pad(x, ((0, 0), (0, 0), (0, hw_pad - hw)))
        t = jnp.pad(t, ((0, 0), (0, 0), (0, hw_pad - hw)),
                    constant_values=ignore_index)

    grid = (N, halves, tiles_per_half)

    out = pl.pallas_call(
        functools.partial(_sce_kernel, ignore_index=ignore_index),
        out_shape=jax.ShapeDtypeStruct((N, halves, 3, tile), jnp.float32),
        grid_spec=pltpu.PrefetchScalarGridSpec(
            num_scalar_prefetch=0,
            grid=grid,
            in_specs=[
                pl.BlockSpec((None, C, tile),
                             lambda n, h, j: (n, 0, h * tiles_per_half + j)),
                pl.BlockSpec((None, 1, tile),
                             lambda n, h, j: (n, 0, h * tiles_per_half + j)),
            ],
            out_specs=pl.BlockSpec((None, None, 3, tile),
                                   lambda n, h, j: (n, h, 0, 0)),
        ),
        compiler_params=pltpu.CompilerParams(
            dimension_semantics=("parallel", "parallel", "arbitrary"),
            vmem_limit_bytes=48 * 1024 * 1024),
    )(x, t)

    # single fused cross-lane reduce in the wrapper
    sums = jnp.sum(out, axis=(0, 1, 3))   # (3,) -> [ce_sum, valid_cnt, rce_sum]
    ce_loss = sums[0] / sums[1]           # NaN if every pixel is ignored (matches PyTorch)
    rce_loss = sums[2] / jnp.float32(P)   # mean over ALL real pixels (matches .mean())
    return alpha * ce_loss + beta * rce_loss


def _reference_loss(inputs, targets, *, alpha=1.0, beta=0.1,
                    num_classes=14, ignore_index=255):
    """Pure-JAX reference mirroring the PyTorch forward."""
    logits = inputs.astype(jnp.float32)
    logp = jax.nn.log_softmax(logits, axis=1)                     # (N,C,H,W)
    valid = (targets != ignore_index)                             # (N,H,W)
    t_adj = jnp.where(valid, targets, 0)
    oh = jax.nn.one_hot(t_adj, num_classes, axis=1)               # (N,C,H,W)
    ce_per = -jnp.sum(oh * logp, axis=1)                          # (N,H,W)
    ce = jnp.sum(ce_per * valid) / jnp.sum(valid)
    sm = jax.nn.softmax(logits, axis=1)
    oh_masked = oh * valid[:, None, :, :]
    rce = -jnp.mean(jnp.sum(oh_masked * jnp.log(sm + 1e-6), axis=1))
    return alpha * ce + beta * rce


if __name__ == "__main__":
    key = jax.random.PRNGKey(0)
    k_x, k_t, k_m = jax.random.split(key, 3)

    N, C, H, W = 2, 14, 16, 16
    ignore_index = 255

    inputs = jax.random.normal(k_x, (N, C, H, W), dtype=jnp.float32)
    targets = jax.random.randint(k_t, (N, H, W), 0, C, dtype=jnp.int32)
    # mark ~20% of pixels as ignored
    ignore_mask = jax.random.bernoulli(k_m, 0.2, (N, H, W))
    targets = jnp.where(ignore_mask, ignore_index, targets)

    loss = sym_cross_entropy(inputs, targets, alpha=1.0, beta=0.1,
                             num_classes=C, ignore_index=ignore_index)
    loss = jax.block_until_ready(loss)

    ref = _reference_loss(inputs, targets, alpha=1.0, beta=0.1,
                          num_classes=C, ignore_index=ignore_index)
    ref = jax.block_until_ready(ref)

    assert jnp.isfinite(loss), "kernel produced non-finite loss"
    assert jnp.allclose(loss, ref, rtol=1e-5, atol=1e-5), (loss, ref)
    print("KERNEL_OK")
</pallas_src>

<mosaic_0001>
module attributes {stable_mosaic.version = 11 : i64} {
  func.func @_sce_kernel(%arg0: i32, %arg1: i32, %arg2: i32, %arg3: memref<1x14x256xf32, #tpu.memory_space<vmem>>, %arg4: memref<1x1x256xi32, #tpu.memory_space<vmem>>, %arg5: memref<1x1x3x256xf32, #tpu.memory_space<vmem>>) attributes {dimension_semantics = [#tpu.dimension_semantics<parallel>, #tpu.dimension_semantics<parallel>, #tpu.dimension_semantics<arbitrary>], iteration_bounds = array<i64: 2, 1, 1>, scalar_prefetch = 0 : i64, scratch_operands = 0 : i64, tpu.core_type = #tpu.core_type<tc>, window_params = [{transform_indices = @transform_0, window_bounds = array<i64: 1, 14, 256>}, {transform_indices = @transform_1, window_bounds = array<i64: 1, 1, 256>}, {transform_indices = @transform_2, window_bounds = array<i64: 1, 1, 3, 256>}]} {
    %c0_i32 = arith.constant 0 : i32
    %0 = arith.cmpi eq, %arg2, %c0_i32 : i32
    %1 = arith.extui %0 : i1 to i32
    %c0_i32_0 = arith.constant 0 : i32
    %2 = arith.cmpi ne, %1, %c0_i32_0 : i32
    scf.if %2 {
      %cst_21 = arith.constant 0.000000e+00 : f32
      %46 = vector.broadcast %cst_21 : f32 to vector<3x256xf32>
      %c0_22 = arith.constant 0 : index
      %c0_23 = arith.constant 0 : index
      %c0_24 = arith.constant 0 : index
      %c0_25 = arith.constant 0 : index
      %47 = vector.load %arg5[%c0_22, %c0_23, %c0_24, %c0_25] : memref<1x1x3x256xf32, #tpu.memory_space<vmem>>, vector<1x1x3x256xf32>
      %48 = vector.shape_cast %47 : vector<1x1x3x256xf32> to vector<3x256xf32>
      %49 = vector.shape_cast %46 : vector<3x256xf32> to vector<1x1x3x256xf32>
      tpu.vector_store %arg5[%c0_22, %c0_23, %c0_24, %c0_25], %49 {strides = array<i32>} : memref<1x1x3x256xf32, #tpu.memory_space<vmem>>, vector<1x1x3x256xf32>,
    } else {
    }
    %c0 = arith.constant 0 : index
    %c0_1 = arith.constant 0 : index
    %c0_2 = arith.constant 0 : index
    %3 = vector.load %arg3[%c0, %c0_1, %c0_2] : memref<1x14x256xf32, #tpu.memory_space<vmem>>, vector<1x14x256xf32>
    %4 = vector.shape_cast %3 : vector<1x14x256xf32> to vector<14x256xf32>
    %c0_3 = arith.constant 0 : index
    %c0_4 = arith.constant 0 : index
    %c0_5 = arith.constant 0 : index
    %5 = vector.load %arg4[%c0_3, %c0_4, %c0_5] : memref<1x1x256xi32, #tpu.memory_space<vmem>>, vector<1x1x256xi32>
    %6 = vector.shape_cast %5 : vector<1x1x256xi32> to vector<1x256xi32>
    %c255_i32 = arith.constant 255 : i32
    %7 = vector.broadcast %c255_i32 : i32 to vector<1x256xi32>
    %8 = arith.cmpi ne, %6, %7 : vector<1x256xi32>
    %9 = arith.extui %8 : vector<1x256xi1> to vector<1x256xi32>
    %10 = arith.sitofp %9 : vector<1x256xi32> to vector<1x256xf32>
    %cst = arith.constant dense<0xFF800000> : vector<256xf32>
    %11 = vector.multi_reduction <maximumf>, %4, %cst [0] : vector<14x256xf32> to vector<256xf32>
    %12 = vector.shape_cast %11 : vector<256xf32> to vector<1x256xf32>
    %13 = vector.broadcast %12 : vector<1x256xf32> to vector<14x256xf32>
    %14 = arith.subf %4, %13 : vector<14x256xf32>
    %15 = math.exp %14 : vector<14x256xf32>
    %cst_6 = arith.constant dense<0.000000e+00> : vector<256xf32>
    %16 = vector.multi_reduction <add>, %15, %cst_6 [0] : vector<14x256xf32> to vector<256xf32>
    %17 = vector.shape_cast %16 : vector<256xf32> to vector<1x256xf32>
    %18 = math.log %17 : vector<1x256xf32>
    %19 = tpu.iota {dimensions = array<i32: 0>} : vector<14x256xi32>
    %20 = vector.broadcast %6 : vector<1x256xi32> to vector<14x256xi32>
    %21 = arith.cmpi eq, %19, %20 : vector<14x256xi32>
    %cst_7 = arith.constant 0.000000e+00 : f32
    %22 = vector.broadcast %cst_7 : f32 to vector<14x256xf32>
    %23 = arith.select %21, %14, %22 : vector<14x256xi1>, vector<14x256xf32>
    %cst_8 = arith.constant dense<0.000000e+00> : vector<256xf32>
    %24 = vector.multi_reduction <add>, %23, %cst_8 [0] : vector<14x256xf32> to vector<256xf32>
    %25 = vector.shape_cast %24 : vector<256xf32> to vector<1x256xf32>
    %cst_9 = arith.constant 0.000000e+00 : f32
    %26 = vector.broadcast %cst_9 : f32 to vector<14x256xf32>
    %27 = arith.select %21, %15, %26 : vector<14x256xi1>, vector<14x256xf32>
    %cst_10 = arith.constant dense<0.000000e+00> : vector<256xf32>
    %28 = vector.multi_reduction <add>, %27, %cst_10 [0] : vector<14x256xf32> to vector<256xf32>
    %29 = vector.shape_cast %28 : vector<256xf32> to vector<1x256xf32>
    %30 = arith.subf %18, %25 : vector<1x256xf32>
    %31 = arith.mulf %30, %10 : vector<1x256xf32>
    %32 = arith.divf %29, %17 : vector<1x256xf32>
    %cst_11 = arith.constant 9.99999997E-7 : f32
    %33 = vector.broadcast %cst_11 : f32 to vector<1x256xf32>
    %34 = arith.addf %32, %33 : vector<1x256xf32>
    %35 = math.log %34 : vector<1x256xf32>
    %cst_12 = arith.constant 0.000000e+00 : f32
    %36 = vector.broadcast %cst_12 : f32 to vector<1x256xf32>
    %37 = arith.subf %36, %35 : vector<1x256xf32>
    %38 = arith.mulf %37, %10 : vector<1x256xf32>
    %c0_13 = arith.constant 0 : index
    %c0_14 = arith.constant 0 : index
    %c0_15 = arith.constant 0 : index
    %c0_16 = arith.constant 0 : index
    %39 = vector.load %arg5[%c0_13, %c0_14, %c0_15, %c0_16] : memref<1x1x3x256xf32, #tpu.memory_space<vmem>>, vector<1x1x3x256xf32>
    %40 = vector.shape_cast %39 : vector<1x1x3x256xf32> to vector<3x256xf32>
    %41 = tpu.concatenate %31, %10, %38 in 0 : vector<1x256xf32>, vector<1x256xf32>, vector<1x256xf32> -> vector<3x256xf32>
    %42 = arith.addf %40, %41 : vector<3x256xf32>
    %c0_17 = arith.constant 0 : index
    %c0_18 = arith.constant 0 : index
    %c0_19 = arith.constant 0 : index
    %c0_20 = arith.constant 0 : index
    %43 = vector.load %arg5[%c0_17, %c0_18, %c0_19, %c0_20] : memref<1x1x3x256xf32, #tpu.memory_space<vmem>>, vector<1x1x3x256xf32>
    %44 = vector.shape_cast %43 : vector<1x1x3x256xf32> to vector<3x256xf32>
    %45 = vector.shape_cast %42 : vector<3x256xf32> to vector<1x1x3x256xf32>
    tpu.vector_store %arg5[%c0_17, %c0_18, %c0_19, %c0_20], %45 {strides = array<i32>} : memref<1x1x3x256xf32, #tpu.memory_space<vmem>>, vector<1x1x3x256xf32>,
    return
  }
  func.func @transform_0(%arg0: i32, %arg1: i32, %arg2: i32) -> (i32, i32, i32) {
    %c1_i32 = arith.constant 1 : i32
    %0 = arith.muli %arg1, %c1_i32 : i32
    %1 = arith.addi %0, %arg2 : i32
    %c0_i32 = arith.constant 0 : i32
    %c0_i32_0 = arith.constant 0 : i32
    return %arg0, %c0_i32, %1 : i32, i32, i32
  }
  func.func @transform_1(%arg0: i32, %arg1: i32, %arg2: i32) -> (i32, i32, i32) {
    %c1_i32 = arith.constant 1 : i32
    %0 = arith.muli %arg1, %c1_i32 : i32
    %1 = arith.addi %0, %arg2 : i32
    %c0_i32 = arith.constant 0 : i32
    %c0_i32_0 = arith.constant 0 : i32
    return %arg0, %c0_i32, %1 : i32, i32, i32
  }
  func.func @transform_2(%arg0: i32, %arg1: i32, %arg2: i32) -> (i32, i32, i32, i32) {
    %c0_i32 = arith.constant 0 : i32
    %c0_i32_0 = arith.constant 0 : i32
    %c0_i32_1 = arith.constant 0 : i32
    return %arg0, %arg1, %c0_i32, %c0_i32_0 : i32, i32, i32, i32
  }
}

</mosaic_0001>

<bundles_post_ra>
// kernel: tpu_custom_call.1
= control target key start
LH: loop header
LB: loop body
LE: loop exit
PB: predicated region body
PF: predicated region fallthrough
CT: control target
= control target key end

     0   :  { %s608_s9 = smov 0   ;;  %s610_s10 = smov 0   ;;  %s696_s0 = inlined_call_operand.vmem [shape: f32[2,14,256], index: 0, kind: input, shape index: {}]   ;;  %s697_s1 = inlined_call_operand.vmem [shape: s32[2,1,256], index: 1, kind: input, shape index: {}]   ;;  %s698_s2 = inlined_call_operand.vmem [shape: f32[2,1,3,256], index: 2, kind: output, shape index: {}]  }
   0x1   :  { %s612_s11 = smov 0  }
   0x2 LB: > { %s31_s12 = sadd.s32 1, %s586_s10  ;;  %p512_p0 = scmp.ge.s32.totalorder %s590_s11, 1  ;;  %s590_s11 = sphi %s612_s11, %s12_s11   ;;  %s586_s10 = sphi %s610_s10, %s700_s10   ;;  %s582_s9 = sphi %s608_s9, %s699_s9  }
   0x3   : > { %p33_p1 = scmp.ge.s32.totalorder %s31_s12, 2  ;;  %p164_p2 = scmp.lt.s32.totalorder %s590_s11, 3 }
   0x5   : > { %s702_s12 = smov (%p33_p1, %s31_s12), 0  ;;  %p165_p3 = pnand %p512_p0, %p164_p2 }
   0x6   : > { %p206_p4 = scmp.lt.s32.totalorder (!%p165_p3), %s582_s9, 1  ;;  %vm249_vm0 = vcmask (!%p165_p3), 1045504   ;;  %v592_v5 = vmov (!%p165_p3), 0.0   ;;  %v298_v19 = vlaneseq (!%p165_p3)  ;;  %vm389_vm6 = vcmask (!%p165_p3), 1040384  }
   0x7   : > { %168 = sbr.rel (%p165_p3) target bundleno = 106 (0x6a), region = 28  ;;  %vm392_vm7 = vcmask (!%p165_p3), 1041408  }
   0x8   : > { %v643_v26 = vshrl.u32 (!%p165_p3), %v298_v19, 7 }
   0xa   : > { %v303_v31 = vsub.s32 (!%p165_p3), 0, %v643_v26  ;;  %v307_v33 = vsub.s32 (!%p165_p3), 1, %v643_v26  ;;  %v300_v35 = vadd.s32 (!%p165_p3), 8, %v643_v26 }
   0xe   : > { %s704_s9 = smov (!%p206_p4, %s582_s9), 1 }
   0xf   : > { %s521_s13 = sshll.u32 %s704_s9, 5  ;;  %s522_s17 = sshll.u32 %s704_s9, 3 }
  0x10   : > { %s213_s16 = scalar_lea.vmem %s696_s0, %s521_s13  ;;  %s636_s20 = scalar_lea.vmem %s698_s2, %s522_s17 }
  0x11   : > { %v241_v0 = vld [vmem:[%s213_s16] sm:$0xff]  ;;  %v242_v1 = vld [vmem:[%s213_s16 + $0x8] sm:$0xff]  ;;  %v243_v2 = vld [vmem:[%s213_s16 + $0x10] sm:$0x3f]  ;;  %240 = vst [vmem:[%s636_s20] sm:$0x77] %v592_v5  ;;  %s515_s21 = sshll.u32 %s704_s9, 1 }
  0x12   : > { %v244_v3 = vld [vmem:[%s213_s16 + $0x18] sm:$0x3f]  ;;  %v250_v4 = vsel %vm249_vm0, %v243_v2, -inf  ;;  %s224_s24 = scalar_lea.vmem %s697_s1, %s515_s21 }
  0x13   : > { %v251_v6 = vmax.f32 %v241_v0, %v250_v4  ;;  %v258_v7 = vsel %vm249_vm0, %v244_v3, -inf  ;;  %v649_v32 = vld [vmem:[%s224_s24] sm:$0x3] }
  0x14   : > { %v259_v8 = vmax.f32 %v242_v1, %v258_v7  ;;  %v304_v34 = vrot.slane %v649_v32, %v303_v31  ;;  %v308_v36 = vrot.slane %v649_v32, %v307_v33  ;;  %vm246_vm5 = vcmp.ne.s32.totalorder %v649_v32, 255 }
  0x15   : > { %v252_v9 = vrot.slane %v251_v6, 4 }
  0x16   : > { %v260_v10 = vrot.slane %v259_v8, 4  ;;  %vm309_vm1 = vcmp.eq.s32.totalorder %v643_v26, %v304_v34  ;;  %vm310_vm2 = vcmp.eq.s32.totalorder %v643_v26, %v308_v36  ;;  %vm311_vm3 = vcmp.eq.s32.totalorder %v300_v35, %v304_v34 }
  0x17   : > { %v253_v11 = vmax.f32 %v251_v6, %v252_v9  ;;  %vm312_vm4 = vcmp.eq.s32.totalorder %v300_v35, %v308_v36 }
  0x18   : > { %v261_v12 = vmax.f32 %v259_v8, %v260_v10 }
  0x19   : > { %v254_v13 = vrot.slane %v253_v11, 2 }
  0x1a   : > { %v262_v14 = vrot.slane %v261_v12, 2 }
  0x1b   : > { %v255_v15 = vmax.f32 %v253_v11, %v254_v13 }
  0x1c   : > { %v263_v16 = vmax.f32 %v261_v12, %v262_v14 }
  0x1d   : > { %v256_v17 = vrot.slane %v255_v15, 1 }
  0x1e   : > { %v264_v18 = vrot.slane %v263_v16, 1 }
  0x1f   : > { %v257_v20 = vmax.f32 %v255_v15, %v256_v17 }
  0x20   : > { %v265_v21 = vmax.f32 %v263_v16, %v264_v18 }
  0x21   : > { %v266_v22 = vsub.f32 %v241_v0, %v257_v20  ;;  %v268_v23 = vsub.f32 %v243_v2, %v257_v20 }
  0x22   : > { %v267_v24 = vsub.f32 %v242_v1, %v265_v21  ;;  %v269_v25 = vsub.f32 %v244_v3, %v265_v21 }
  0x23   : > { %v270_v27 = vmul.f32 1.442695, %v266_v22  ;;  %v274_v28 = vmul.f32 1.442695, %v268_v23  ;;  %v315_v59 = vsel %vm311_vm3, %v268_v23, 0.0  ;;  %v313_v1 = vsel %vm309_vm1, %v266_v22, 0.0 }
  0x24   : > { %v272_v29 = vmul.f32 1.442695, %v267_v24  ;;  %v276_v30 = vmul.f32 1.442695, %v269_v25  ;;  %v316_v61 = vsel %vm312_vm4, %v269_v25, 0.0  ;;  %v317_v2 = vsel %vm249_vm0, %v315_v59, 0.0 }
  0x25   : > { %548 = vpow2.f32 %v270_v27  ;;  %v314_v6 = vsel %vm310_vm2, %v267_v24, 0.0  ;;  %v325_v7 = vsel %vm249_vm0, %v316_v61, 0.0  ;;  %v318_v10 = vadd.f32 %v317_v2, %v313_v1 }
  0x26   : > { %550 = vpow2.f32 %v272_v29  ;;  %v326_v13 = vadd.f32 %v325_v7, %v314_v6 }
  0x27   : > { %552 = vpow2.f32 %v274_v28  ;;  %v319_v16 = vrot.slane %v318_v10, 4 }
  0x28   : > { %554 = vpow2.f32 %v276_v30  ;;  %v327_v18 = vrot.slane %v326_v13, 4 }
  0x29   : > { %v320_v20 = vadd.f32 %v319_v16, %v318_v10 }
  0x2a   : > { %v328_v22 = vadd.f32 %v327_v18, %v326_v13 }
  0x2b   : > { %v321_v24 = vrot.slane %v320_v20, 2 }
  0x2c   : > { %v329_v27 = vrot.slane %v328_v22, 2 }
  0x2d   : > { %v322_v34 = vadd.f32 %v321_v24, %v320_v20 }
  0x2e   : > { %v330_v36 = vadd.f32 %v329_v27, %v328_v22 }
  0x2f   : > { %v549_v37 = vpop.eup %548 }
  0x30   : > { %v551_v38 = vpop.eup %550  ;;  %v333_v40 = vsel %vm309_vm1, %v549_v37, 0.0 }
  0x31   : > { %v553_v39 = vpop.eup %552  ;;  %v334_v43 = vsel %vm310_vm2, %v551_v38, 0.0 }
  0x32   : > { %v555_v41 = vpop.eup %554  ;;  %v278_v42 = vsel %vm249_vm0, %v553_v39, 0.0  ;;  %v335_v44 = vsel %vm311_vm3, %v553_v39, 0.0 }
  0x33   : > { %v279_v45 = vadd.f32 %v549_v37, %v278_v42  ;;  %v286_v46 = vsel %vm249_vm0, %v555_v41, 0.0  ;;  %v336_v47 = vsel %vm312_vm4, %v555_v41, 0.0  ;;  %v337_v48 = vsel %vm249_vm0, %v335_v44, 0.0 }
  0x34   : > { %v287_v49 = vadd.f32 %v551_v38, %v286_v46  ;;  %v338_v50 = vadd.f32 %v337_v48, %v333_v40  ;;  %v345_v51 = vsel %vm249_vm0, %v336_v47, 0.0  ;;  %v323_v40 = vrot.slane %v322_v34, 1 }
  0x35   : > { %v280_v52 = vrot.slane %v279_v45, 4  ;;  %v346_v53 = vadd.f32 %v345_v51, %v334_v43  ;;  %v331_v42 = vrot.slane %v330_v36, 1  ;;  %v518_v46 = vsel %vm246_vm5, 1.0, %v592_v5 }
  0x36   : > { %v288_v54 = vrot.slane %v287_v49, 4  ;;  %v339_v55 = vrot.slane %v338_v50, 4 }
  0x37   : > { %v281_v56 = vadd.f32 %v280_v52, %v279_v45  ;;  %v347_v57 = vrot.slane %v346_v53, 4  ;;  %v324_v45 = vadd.f32 %v323_v40, %v322_v34  ;;  %v332_v48 = vadd.f32 %v331_v42, %v330_v36 }
  0x38   : > { %v289_v58 = vadd.f32 %v288_v54, %v287_v49  ;;  %v340_v63 = vadd.f32 %v339_v55, %v338_v50  ;;  %v359_v50 = vrot.slane %v518_v46, %v303_v31  ;;  %v363_v52 = vrot.slane %v518_v46, %v307_v33  ;;  %v382_v33 = vld [vmem:[%s636_s20] sm:$0x77] }
  0x39   : > { %v282_v60 = vrot.slane %v281_v56, 2  ;;  %v348_v3 = vadd.f32 %v347_v57, %v346_v53 }
  0x3a   : > { %v290_v62 = vrot.slane %v289_v58, 2  ;;  %v341_v11 = vrot.slane %v340_v63, 2 }
  0x3b   : > { %v283_v0 = vadd.f32 %v282_v60, %v281_v56  ;;  %v349_v14 = vrot.slane %v348_v3, 2 }
  0x3c   : > { %v291_v4 = vadd.f32 %v290_v62, %v289_v58  ;;  %v342_v17 = vadd.f32 %v341_v11, %v340_v63 }
  0x3d   : > { %v284_v8 = vrot.slane %v283_v0, 1  ;;  %v350_v19 = vadd.f32 %v349_v14, %v348_v3 }
  0x3e   : > { %v292_v9 = vrot.slane %v291_v4, 1  ;;  %v343_v21 = vrot.slane %v342_v17, 1 }
  0x3f   : > { %v285_v12 = vadd.f32 %v284_v8, %v283_v0  ;;  %v351_v23 = vrot.slane %v350_v19, 1 }
  0x40   : > { %v293_v15 = vadd.f32 %v292_v9, %v291_v4  ;;  %v344_v25 = vadd.f32 %v343_v21, %v342_v17 }
  0x41   : > { %556 = vrcp.f32 %v285_v12  ;;  %v352_v28 = vadd.f32 %v351_v23, %v350_v19 }
  0x42   : > { %558 = vrcp.f32 %v293_v15 }
  0x43   : > { %560 = vlog2.f32 %v285_v12 }
  0x44   : > { %562 = vlog2.f32 %v293_v15 }
  0x4b   : > { %v557_v29 = vpop.eup %556 }
  0x4c   : > { %v559_v30 = vpop.eup %558  ;;  %v369_v35 = vmul.f32 %v557_v29, %v344_v25 }
  0x4d   : > { %v371_v37 = vmul.f32 %v559_v30, %v352_v28  ;;  %v561_v41 = vpop.eup %560 }
  0x4e   : > { %v372_v38 = vadd.f32 1e-06, %v369_v35  ;;  %v563_v43 = vpop.eup %562  ;;  %v295_v44 = vmul.f32 0.6931472, %v561_v41 }
  0x4f   : > { %v373_v39 = vadd.f32 1e-06, %v371_v37  ;;  %v297_v47 = vmul.f32 0.6931472, %v563_v43 }
  0x50   : > { %564 = vlog2.f32 %v372_v38  ;;  %v353_v49 = vsub.f32 %v295_v44, %v324_v45 }
  0x51   : > { %566 = vlog2.f32 %v373_v39  ;;  %v354_v51 = vsub.f32 %v297_v47, %v332_v48 }
  0x52   : > { %v366_v56 = vmul.f32 %v359_v50, %v353_v49 }
  0x53   : > { %v367_v57 = vmul.f32 %v363_v52, %v354_v51 }
  0x54   : > { %v390_v61 = vsel %vm389_vm6, %v366_v56, %v359_v50 }
  0x55   : > { %v391_v62 = vsel %vm389_vm6, %v367_v57, %v363_v52 }
  0x5a   : > { %v565_v53 = vpop.eup %564 }
  0x5b   : > { %v567_v54 = vpop.eup %566  ;;  %v375_v55 = vmul.f32 0.6931472, %v565_v53 }
  0x5c   : > { %v377_v32 = vmul.f32 0.6931472, %v567_v54 }
  0x5d   : > { %v378_v58 = vsub.f32 0.0, %v375_v55 }
  0x5e   : > { %v379_v5 = vsub.f32 0.0, %v377_v32 }
  0x5f   : > { %v380_v59 = vmul.f32 %v378_v58, %v359_v50 }
  0x60   : > { %v381_v60 = vmul.f32 %v379_v5, %v363_v52 }
  0x61   : > { %v385_v31 = vrot.slane %v380_v59, 6 }
  0x62   : > { %v386_v63 = vrot.slane %v381_v60, 6 }
  0x63   : > { %v393_v26 = vsel %vm392_vm7, %v390_v61, %v385_v31 }
  0x64   : > { %v394_v0 = vsel %vm392_vm7, %v391_v62, %v386_v63 }
  0x65   : > { %v397_v1 = vcombine.low %v393_v26, %v394_v0 }
  0x67   : > { %v399_v2 = vadd.f32 %v397_v1, %v382_v33 }
  0x69   : > { %400 = vst [vmem:[%s636_s20] sm:$0x77] %v399_v2 }
  0x6a PF: > { %s12_s11 = sadd.s32 1, %s590_s11   ;;  %s699_s9 = smov %s586_s10 }
  0x6b   : > { %p9_p5 = scmp.ge.s32.totalorder %s12_s11, 4   ;;  %s700_s10 = smov %s702_s12 }
  0x6d   :  { %11 = sbr.rel (!%p9_p5) target bundleno = 2 (0x2), region = 65 }

</bundles_post_ra>
